<compile_context>
chip_gen: v7x
topology: tpu7x:2x2x1
jax: 0.10.0
libtpu: 0.0.40
codegen_flags: <defaults>
</compile_context>

<pallas_src>
import jax
import jax.numpy as jnp
import numpy as np
from jax.experimental import pallas as pl
from jax.experimental.pallas import tpu as pltpu


def _fused_matmul_kernel(w_ref, b_ref, cols_ref, o_ref):
    # w_ref:    (K, CKK)   fused (pointwise o BN o depthwise) weight
    # b_ref:    (K, 1)     fused bias (always f32, exact)
    # cols_ref: (CKK, BM)  lane-dense im2col block, BM % 128 == 0
    # o_ref:    (K, BM)    lane-dense output block
    out = jnp.dot(w_ref[...], cols_ref[...],
                  preferred_element_type=jnp.float32)
    o_ref[...] = (out + b_ref[...]).astype(o_ref.dtype)


def depthwise_sep_conv2d_forward(x, dw_w, dw_b, bn_gamma, bn_beta, bn_mean,
                                 bn_var, pw_w, pw_b, *, stride=1, padding=0,
                                 dilation=1, eps=1e-5,
                                 matmul_dtype=jnp.float32, block_m_cap=4096):
    """x: (N,C,H,W) f32. dw_w: (C,1,k,k). pw_w: (K,C,1,1). Eval-mode BN."""
    N, C, H, W = x.shape
    K = pw_w.shape[0]
    k = dw_w.shape[2]
    Ho = (H + 2 * padding - dilation * (k - 1) - 1) // stride + 1
    Wo = (W + 2 * padding - dilation * (k - 1) - 1) // stride + 1
    CKK = C * k * k

    # ---- Fold BN (eval) into depthwise, then depthwise into pointwise. ------
    s = bn_gamma / jnp.sqrt(bn_var + eps)                         # (C,)
    dw_folded = dw_w.reshape(C, k * k) * s[:, None]               # (C, k*k)
    db_folded = s * (dw_b - bn_mean) + bn_beta                    # (C,)
    pw2d = pw_w.reshape(K, C)
    w_fused = (pw2d[:, :, None] * dw_folded[None, :, :]).reshape(K, CKK)
    b_fused = (pw2d @ db_folded + pw_b).reshape(K, 1).astype(jnp.float32)

    # ---- Wrapper-side layout plumbing: zero-pad + im2col, lane-dense. -------
    xp = jnp.pad(x, ((0, 0), (0, 0), (padding, padding), (padding, padding)))
    patches = []
    for ki in range(k):
        for kj in range(k):
            h0, w0 = ki * dilation, kj * dilation
            # Strided subsample done ONCE here (not per grid step / per tap).
            win = jax.lax.slice(
                xp, (0, 0, h0, w0),
                (N, C, h0 + (Ho - 1) * stride + 1, w0 + (Wo - 1) * stride + 1),
                (1, 1, stride, stride))                           # (N,C,Ho,Wo)
            patches.append(win)
    cols = jnp.stack(patches, axis=2).reshape(N, CKK, Ho * Wo)    # (c,ki,kj) order
    cols = jnp.transpose(cols, (1, 0, 2)).reshape(CKK, N * Ho * Wo)

    M = N * Ho * Wo
    M_pad = ((M + 127) // 128) * 128            # keep stores unmasked (lane-dense)
    if M_pad != M:
        cols = jnp.pad(cols, ((0, 0), (0, M_pad - M)))

    bm = min(M_pad, block_m_cap)
    while M_pad % bm:
        bm -= 128
    grid = (M_pad // bm,)

    # bf16 operands (v6e/v7x MXU fast path); accumulate stays f32.
    w_fused = w_fused.astype(matmul_dtype)
    cols = cols.astype(matmul_dtype)

    flops = 2 * K * CKK * M_pad
    bytes_accessed = int(w_fused.size * w_fused.dtype.itemsize
                         + cols.size * cols.dtype.itemsize
                         + 4 * (K * M_pad + K))

    out = pl.pallas_call(
        _fused_matmul_kernel,
        out_shape=jax.ShapeDtypeStruct((K, M_pad), jnp.float32),
        grid_spec=pltpu.PrefetchScalarGridSpec(
            num_scalar_prefetch=0,
            grid=grid,
            in_specs=[
                # Constant index_maps: weights/bias stay resident, no re-DMA.
                pl.BlockSpec((K, CKK), lambda m: (0, 0)),
                pl.BlockSpec((K, 1), lambda m: (0, 0)),
                pl.BlockSpec((CKK, bm), lambda m: (0, m)),
            ],
            out_specs=pl.BlockSpec((K, bm), lambda m: (0, m)),
        ),
        compiler_params=pltpu.CompilerParams(
            dimension_semantics=("parallel",),
            vmem_limit_bytes=32 * 1024 * 1024),   # fits v7x's 64 MiB VMEM too
        cost_estimate=pl.CostEstimate(flops=flops, transcendentals=0,
                                      bytes_accessed=bytes_accessed),
    )(w_fused, b_fused, cols)

    out = out[:, :M].reshape(K, N, Ho, Wo)
    return jnp.transpose(out, (1, 0, 2, 3))       # NCHW


def _reference(x, dw_w, dw_b, bn_gamma, bn_beta, bn_mean, bn_var, pw_w, pw_b,
               *, stride, padding, dilation, eps=1e-5):
    """Independent pure-JAX reference (XLA grouped conv + eval BN + 1x1)."""
    N, C, H, W = x.shape
    K = pw_w.shape[0]
    y = jax.lax.conv_general_dilated(
        x, dw_w,
        window_strides=(stride, stride),
        padding=((padding, padding), (padding, padding)),
        rhs_dilation=(dilation, dilation),
        dimension_numbers=('NCHW', 'OIHW', 'NCHW'),
        feature_group_count=C)
    y = y + dw_b.reshape(1, C, 1, 1)
    y = (y - bn_mean.reshape(1, C, 1, 1)) / jnp.sqrt(
        bn_var.reshape(1, C, 1, 1) + eps)
    y = y * bn_gamma.reshape(1, C, 1, 1) + bn_beta.reshape(1, C, 1, 1)
    out = jnp.einsum('kc,nchw->nkhw', pw_w.reshape(K, C), y)
    return out + pw_b.reshape(1, K, 1, 1)


if __name__ == "__main__":
    key = jax.random.PRNGKey(0)
    keys = jax.random.split(key, 8)

    N, C, K = 2, 4, 8              # batch, in_channels, out_channels
    H = W = 16
    kernel_size, stride, padding, dilation = 3, 1, 1, 1

    x = jax.random.normal(keys[0], (N, C, H, W), dtype=jnp.float32)
    dw_w = jax.random.normal(keys[1], (C, 1, kernel_size, kernel_size),
                             dtype=jnp.float32) * (1.0 / kernel_size)
    dw_b = jax.random.normal(keys[2], (C,), dtype=jnp.float32) * 0.1
    bn_gamma = 1.0 + 0.1 * jax.random.normal(keys[3], (C,), dtype=jnp.float32)
    bn_beta = 0.1 * jax.random.normal(keys[4], (C,), dtype=jnp.float32)
    bn_mean = 0.1 * jax.random.normal(keys[5], (C,), dtype=jnp.float32)
    bn_var = jax.random.uniform(keys[6], (C,), minval=0.5, maxval=1.5,
                                dtype=jnp.float32)
    pw_w = jax.random.normal(keys[7], (K, C, 1, 1), dtype=jnp.float32) \
        * (1.0 / np.sqrt(C))
    pw_b = 0.1 * jax.random.normal(keys[2], (K,), dtype=jnp.float32)

    ref = _reference(x, dw_w, dw_b, bn_gamma, bn_beta, bn_mean, bn_var,
                     pw_w, pw_b, stride=stride, padding=padding,
                     dilation=dilation)

    # f32 matmul path (exact): tight tolerance.
    out = depthwise_sep_conv2d_forward(
        x, dw_w, dw_b, bn_gamma, bn_beta, bn_mean, bn_var, pw_w, pw_b,
        stride=stride, padding=padding, dilation=dilation)
    out = jax.block_until_ready(out)
    assert out.shape == (N, K, H, W), out.shape
    np.testing.assert_allclose(np.asarray(out), np.asarray(ref),
                               rtol=1e-4, atol=1e-4)

    # bf16 MXU operand path (v6e/v7x fast path), f32 accumulate: loose tolerance.
    out_bf16 = depthwise_sep_conv2d_forward(
        x, dw_w, dw_b, bn_gamma, bn_beta, bn_mean, bn_var, pw_w, pw_b,
        stride=stride, padding=padding, dilation=dilation,
        matmul_dtype=jnp.bfloat16)
    out_bf16 = jax.block_until_ready(out_bf16)
    np.testing.assert_allclose(np.asarray(out_bf16), np.asarray(ref),
                               rtol=1e-1, atol=1e-1)

    print("KERNEL_OK")
</pallas_src>

<mosaic_0001>
module attributes {stable_mosaic.version = 11 : i64} {
  func.func @_fused_matmul_kernel(%arg0: i32, %arg1: memref<8x36xf32, #tpu.memory_space<vmem>>, %arg2: memref<8x1xf32, #tpu.memory_space<vmem>>, %arg3: memref<36x512xf32, #tpu.memory_space<vmem>>, %arg4: memref<8x512xf32, #tpu.memory_space<vmem>>) attributes {dimension_semantics = [#tpu.dimension_semantics<parallel>], iteration_bounds = array<i64: 1>, scalar_prefetch = 0 : i64, scratch_operands = 0 : i64, tpu.core_type = #tpu.core_type<tc>, window_params = [{pipeline_mode = #tpu.pipeline_mode<synchronous>, transform_indices = @transform_0, window_bounds = array<i64: 8, 36>}, {pipeline_mode = #tpu.pipeline_mode<synchronous>, transform_indices = @transform_1, window_bounds = array<i64: 8, 1>}, {transform_indices = @transform_2, window_bounds = array<i64: 36, 512>}, {transform_indices = @transform_3, window_bounds = array<i64: 8, 512>}]} {
    %c0 = arith.constant 0 : index
    %c0_0 = arith.constant 0 : index
    %0 = vector.load %arg1[%c0, %c0_0] : memref<8x36xf32, #tpu.memory_space<vmem>>, vector<8x36xf32>
    %c0_1 = arith.constant 0 : index
    %c0_2 = arith.constant 0 : index
    %1 = vector.load %arg3[%c0_1, %c0_2] : memref<36x512xf32, #tpu.memory_space<vmem>>, vector<36x512xf32>
    %cst = arith.constant dense<0.000000e+00> : vector<8x512xf32>
    %2 = tpu.matmul %0, %1, %cst {dimension_numbers = #tpu.dot_dimension_numbers<[1], [0], [0], [1], [0, 0, 1, 1], [], []>} : vector<8x36xf32>, vector<36x512xf32>, vector<8x512xf32> -> vector<8x512xf32>
    %c0_3 = arith.constant 0 : index
    %c0_4 = arith.constant 0 : index
    %3 = vector.load %arg2[%c0_3, %c0_4] : memref<8x1xf32, #tpu.memory_space<vmem>>, vector<8x1xf32>
    %4 = vector.broadcast %3 : vector<8x1xf32> to vector<8x512xf32>
    %5 = arith.addf %2, %4 : vector<8x512xf32>
    %c0_5 = arith.constant 0 : index
    %c0_6 = arith.constant 0 : index
    %6 = vector.load %arg4[%c0_5, %c0_6] : memref<8x512xf32, #tpu.memory_space<vmem>>, vector<8x512xf32>
    tpu.vector_store %arg4[%c0_5, %c0_6], %5 {strides = array<i32>} : memref<8x512xf32, #tpu.memory_space<vmem>>, vector<8x512xf32>,
    return
  }
  func.func @transform_0(%arg0: i32) -> (i32, i32) {
    %c0_i32 = arith.constant 0 : i32
    %c0_i32_0 = arith.constant 0 : i32
    %c0_i32_1 = arith.constant 0 : i32
    return %c0_i32, %c0_i32_0 : i32, i32
  }
  func.func @transform_1(%arg0: i32) -> (i32, i32) {
    %c0_i32 = arith.constant 0 : i32
    %c0_i32_0 = arith.constant 0 : i32
    %c0_i32_1 = arith.constant 0 : i32
    return %c0_i32, %c0_i32_0 : i32, i32
  }
  func.func @transform_2(%arg0: i32) -> (i32, i32) {
    %c0_i32 = arith.constant 0 : i32
    %c0_i32_0 = arith.constant 0 : i32
    return %c0_i32, %arg0 : i32, i32
  }
  func.func @transform_3(%arg0: i32) -> (i32, i32) {
    %c0_i32 = arith.constant 0 : i32
    %c0_i32_0 = arith.constant 0 : i32
    return %c0_i32, %arg0 : i32, i32
  }
}

</mosaic_0001>

<bundles_post_ra>
// kernel: tpu_custom_call.1
= control target key start
LH: loop header
LB: loop body
LE: loop exit
PB: predicated region body
PF: predicated region fallthrough
CT: control target
= control target key end

     0   :  { %8 = vsyncpa [#allocation3], 0  ;;  %s367_s0 = inlined_call_operand.vmem [shape: f32[8,36], index: 0, kind: input, shape index: {}]   ;;  %s368_s1 = inlined_call_operand.vmem [shape: f32[8,1], index: 1, kind: input, shape index: {}]   ;;  %s369_s2 = inlined_call_operand.hbm [shape: f32[36,512], index: 2, kind: input, shape index: {}]   ;;  %s370_s3 = inlined_call_operand.hbm [shape: f32[8,512], index: 3, kind: output, shape index: {}]  }
   0x1   :  { %9 = vsyncpa [#allocation4], 0  ;;  %s311_s12 = smov [#allocation2]   ;;  %s263_s16 = scalar_lea.hbm %s369_s2, 2560 }
   0x2   :  { %s19_s13 = sshll.u32 %s311_s12, 4  ;;  %p264_p0 = scmp.ne.s32.totalorder %s369_s2, %s263_s16  ;;  %s20_s13 = int_to_ptr.vmem [resolvable:$true] %s19_s13 }
   0x3   :  { %p267_p1 = scmp.lt.u32.totalorder %s263_s16, %s369_s2 }
   0x5   :  { %p269_p2 = pnand %p267_p1, %p264_p0 }
   0x7   :  { %272 = shalt.err (!%p269_p2)
}
   0x8   :  { %s273_s21 = scalar_lea.vmem %s20_s13, 2560  ;;  %p278_p4 = scmp.lt.s32.totalorder %s20_s13, %s20_s13 }
   0x9   :  { %p274_p3 = scmp.ne.s32.totalorder %s20_s13, %s273_s21  ;;  %p279_p5 = scmp.lt.s32.totalorder %s273_s21, %s273_s21 }
   0xb   :  { %p280_p6 = por %p279_p5, %p278_p4 }
   0xd   :  { %p281_p7 = pnand %p280_p6, %p274_p3 }
   0xf   :  { %284 = shalt.err (!%p281_p7)
}
  0x10   :  { %s312_s22 = smov 512   ;;  %s313_s23 = smov 32  }
  0x11   :  { %25 = dma.hbm_to_vmem [thread:$0]  %s369_s2, 2560, %s20_s13, [#allocation3], %s312_s22, %s312_s22, %s313_s23  }
  0x12   :  { %307 = dma.done.wait [#allocation3], 2560  }
  0x13   :  { %308 = vsyncadd [#allocation3], 4294964736  ;;  %v314_v0 = vmov 0.0   ;;  %v315_v1 = vmov 0   ;;  %v31_v2 = vld [vmem:[#allocation2 + $0x8] sm:$0xff]  ;;  %v33_v4 = vld [vmem:[#allocation2 + $0x18] sm:$0xff] }
  0x14   :  { %137 = vmatprep.mubr.f32.mxu0 %v314_v0  ;;  %208 = vmatprep.mubr.f32.mxu1 %v314_v0  ;;  %v35_v3 = vld [vmem:[#allocation2 + $0x28] sm:$0xff]  ;;  %v37_v6 = vld [vmem:[#allocation2 + $0x38] sm:$0xff]  ;;  %v30_v7 = vld [vmem:[#allocation2] sm:$0xff]  ;;  %vm60_vm0 = vcmask 1043456   ;;  %vm56_vm1 = vcmask 293888   ;;  %s316_s29 = smov [#allocation5]  }
  0x15   :  { %262 = vset.pattern.permute.xlu0 %v315_v1  ;;  %v240_v5 = vpack.c.bf16 %v35_v3, %v31_v2  ;;  %v34_v8 = vld [vmem:[#allocation2 + $0x20] sm:$0xff]  ;;  %v248_v9 = vpack.c.bf16 %v37_v6, %v33_v4  ;;  %v32_v11 = vld [vmem:[#allocation2 + $0x10] sm:$0xff]  ;;  %v39_v13 = vld [vmem:[#allocation2 + $0x48] sm:$0xff] }
  0x16   :  { %v242_v10 = vpack.c.bf16 %v34_v8, %v30_v7  ;;  %v36_v12 = vld [vmem:[#allocation2 + $0x30] sm:$0xff]  ;;  %v43_v15 = vld [vmem:[#allocation2 + $0x68] sm:$0xff]  ;;  %v41_v16 = vld [vmem:[#allocation2 + $0x58] sm:$0xff] }
  0x17   :  { %241 = vmatprep.subr.bf16.mxu0 %v240_v5  ;;  %v250_v14 = vpack.c.bf16 %v36_v12, %v32_v11  ;;  %v45_v17 = vld [vmem:[#allocation2 + $0x78] sm:$0xff]  ;;  %249 = vmatprep.subr.bf16.mxu1 %v248_v9  ;;  %v244_v18 = vpack.c.bf16 %v43_v15, %v39_v13  ;;  %v38_v20 = vld [vmem:[#allocation2 + $0x40] sm:$0xff]  ;;  %v40_v22 = vld [vmem:[#allocation2 + $0x50] sm:$0xff] }
  0x18   :  { %243 = vmatpush1.bf16.msra.mxu0 %v242_v10  ;;  %v252_v19 = vpack.c.bf16 %v45_v17, %v41_v16  ;;  %v42_v21 = vld [vmem:[#allocation2 + $0x60] sm:$0xff]  ;;  %v44_v24 = vld [vmem:[#allocation2 + $0x70] sm:$0xff]  ;;  %v47_v26 = vld [vmem:[#allocation2 + $0x88] sm:$0xf] }
  0x19   :  { %251 = vmatpush1.bf16.msra.mxu1 %v250_v14  ;;  %v246_v23 = vpack.c.bf16 %v42_v21, %v38_v20  ;;  %245 = vmatprep.subr.bf16.mxu0 %v244_v18  ;;  %v254_v25 = vpack.c.bf16 %v44_v24, %v40_v22  ;;  %v49_v27 = vld [vmem:[#allocation2 + $0x98] sm:$0xf]  ;;  %v50_v28 = vld [vmem:[%s368_s1] sm:$0xff]  ;;  %v48_v30 = vld [vmem:[#allocation2 + $0x90] sm:$0xf]  ;;  %s225_s1 = sshll.u32 %s316_s29, 4  ;;  %s226_s1 = int_to_ptr.vmem [resolvable:$true] %s225_s1 }
  0x1a   :  { %253 = vmatprep.subr.bf16.mxu1 %v252_v19  ;;  %53 = vperm.xlu0 %262, %v50_v28   ;;  %v46_v29 = vld [vmem:[#allocation2 + $0x80] sm:$0xf]  ;;  %p290_p9 = scmp.lt.s32.totalorder %s226_s1, %s226_s1 }
  0x1b   :  { %v29_v31 = vld [vmem:[%s367_s0] sm:$0xff]  ;;  %s285_s0 = scalar_lea.vmem %s226_s1, 512 }
  0x1c   :  { %247 = vmatpush1.bf16.msra.mxu0 %v246_v23  ;;  %p286_p8 = scmp.ne.s32.totalorder %s226_s1, %s285_s0  ;;  %p291_p10 = scmp.lt.s32.totalorder %s285_s0, %s285_s0 }
  0x1d   :  { %255 = vmatpush1.bf16.msra.mxu1 %v254_v25  ;;  %234 = vmatprep.subr.msk.mxu0 %vm60_vm0, %v47_v26 }
  0x1e   :  { %237 = vmatprep.subr.msk.mxu1 %vm60_vm0, %v49_v27  ;;  %p292_p11 = por %p291_p10, %p290_p9 }
  0x20   :  { %235 = vmatpush1.msk.msra.mxu0 %vm60_vm0, %v46_v29  ;;  %p293_p12 = pnand %p292_p11, %p286_p8 }
  0x21   :  { %238 = vmatpush1.msk.msra.mxu1 %vm60_vm0, %v48_v30  ;;  %236 = vmatmul.mubr.msk.f32.vlgmr.msra.gmra.mrb[0].mxu0 %vm56_vm1, %v29_v31 }
  0x22   :  { %239 = vmatmul.mubr.msk.f32.vlgmr.msra.gmra.mrb[0].mxu1 %vm56_vm1, %v29_v31 }
  0x99   :  { %v54_v32 = vpop.permute.xlu0 %53 }
  0xf4   :  { %v139_v33 = vpop.f32.mrb[0].mxu0 }
  0xf5   :  { %v140_v34 = vadd.f32 %v139_v33, %v54_v32  ;;  %v210_v35 = vpop.f32.mrb[0].mxu1  ;;  %v141_v36 = vpop.f32.mrb[1].mxu0 }
  0xf6   :  { %v211_v37 = vadd.f32 %v210_v35, %v54_v32  ;;  %v142_v38 = vadd.f32 %v141_v36, %v54_v32  ;;  %v212_v39 = vpop.f32.mrb[1].mxu1 }
  0xf7   :  { %215 = vst [vmem:[#allocation5] sm:$0xff] %v140_v34  ;;  %v213_v40 = vadd.f32 %v212_v39, %v54_v32 }
  0xf8   :  { %217 = vst [vmem:[#allocation5 + $0x10] sm:$0xff] %v211_v37  ;;  %216 = vst [vmem:[#allocation5 + $0x8] sm:$0xff] %v142_v38 }
  0xf9   :  { %218 = vst [vmem:[#allocation5 + $0x18] sm:$0xff] %v213_v40 }
  0xfa   :  { %296 = shalt.err (!%p293_p12)
}
  0xfb   :  { %s297_s5 = scalar_lea.hbm %s370_s3, 512 }
  0xfc   :  { %p298_p13 = scmp.ne.s32.totalorder %s370_s3, %s297_s5  ;;  %p301_p0 = scmp.lt.u32.totalorder %s297_s5, %s370_s3 }
  0xfe   :  { %p303_p1 = pnand %p301_p0, %p298_p13 }
 0x100   :  { %306 = shalt.err (!%p303_p1)
}
 0x101   :  { %228 = dma.vmem_to_hbm [thread:$0]  %s226_s1, 512, %s370_s3, [#allocation4]  }
 0x102   :  { %309 = dma.done.wait [#allocation4], 512  }
 0x103   :  { %310 = vsyncadd [#allocation4], 4294966784 }
 0x104   :  { %232 = vsyncpa [#allocation3], 1 }
 0x105   :  { %233 = vsyncpa [#allocation4], 1 }

</bundles_post_ra>
